<compile_context>
chip_gen: v7x
topology: tpu7x:2x2x1
jax: 0.10.0
libtpu: 0.0.40
codegen_flags: <defaults>
</compile_context>

<pallas_src>
import functools
import math

import jax
import jax.numpy as jnp
from jax.experimental import pallas as pl
from jax.experimental.pallas import tpu as pltpu


def _round_up(v, mult):
    return ((v + mult - 1) // mult) * mult


def _decay_linear_kernel(x_ref, w_ref, o_ref):
    # x_ref: (tm, Kf), w_ref: (Kf, Nf) -- K on sublanes, N on lanes -> natural
    # MXU layout, single pass, no scratch accumulator needed.
    o_ref[...] = jnp.dot(
        x_ref[...], w_ref[...], preferred_element_type=jnp.float32
    ).astype(o_ref.dtype)


def _choose_fold(k, ncols, m):
    """Token-fold factor for small K.

    Preference order:
      (a) fold making BOTH fold*k (x loads) and fold*ncols (out stores)
          multiples of 128, bumped toward kf=256 (v6e/v7x MXU width) when free,
      (b) fold making only fold*k a multiple of 128 (lane-dense loads),
      (c) no fold.
    A candidate must divide the token count m and keep fold*k <= 512.
    """
    if k >= 128:
        return 1
    fk = 128 // math.gcd(128, k)        # lane-dense x loads
    fn = 128 // math.gcd(128, ncols)    # lane-dense out stores
    f_both = fk * fn // math.gcd(fk, fn)
    prefs = []
    if f_both * k < 256:
        prefs.append(f_both * 2)        # reach kf=256 if it costs nothing
    prefs.append(f_both)
    if fk * k < 256:
        prefs.append(fk * 2)
    prefs.append(fk)
    for f in prefs:
        if f >= 1 and m % f == 0 and f * k <= 512:
            return f
    return 1


def _pick_tile_m(mf, kf, nf, itemsize):
    """Per-generation M tile + scoped-VMEM limit for the streamed token dim."""
    try:
        kind = jax.devices()[0].device_kind.lower()
    except Exception:  # defensive: keep trace-time query from ever breaking us
        kind = ""
    is_v7 = "v7" in kind

    # Budget for the double-buffered x + out streams; v7x has only 64 MiB
    # physical VMEM, v5e/v6e have 128 MiB so we can stream bigger tiles there.
    stream_budget = (20 << 20) if is_v7 else (40 << 20)
    tm_cap = 4096 if is_v7 else 8192
    w_bytes = 2 * kf * nf * itemsize            # resident (double-buffered) weight
    avail = max(stream_budget - w_bytes, 1 << 20)
    tm = max(8, min(tm_cap, (avail // (2 * (kf + nf) * itemsize)) // 8 * 8))

    if mf <= tm:
        if is_v7 and mf >= 2048:
            # Keep both v7x TensorCores fed via the "parallel" grid axis.
            tm = _round_up(pl.cdiv(mf, 2), 8)
        else:
            tm = mf                              # full-dim block (any size OK)

    working_set = 2 * tm * (kf + nf) * itemsize + w_bytes
    cap = (48 << 20) if is_v7 else (100 << 20)
    vmem_limit = int(min(max(working_set + (4 << 20), 32 << 20), cap))
    return tm, vmem_limit


@functools.partial(jax.jit, static_argnames=("rank", "compute_dtype"))
def _decay_linear_pallas(x, weight, rank, compute_dtype=None):
    batch, seq, k = x.shape
    m = batch * seq
    out_dtype = compute_dtype if compute_dtype is not None else x.dtype
    if compute_dtype is not None:
        x = x.astype(compute_dtype)
        weight = weight.astype(compute_dtype)
    itemsize = jnp.dtype(out_dtype).itemsize

    # Pre-transpose the tiny, loop-invariant weight once in XLA: [K, rank]
    # (natural [K, N] MXU layout, no in-kernel relayout).
    w_t = jnp.transpose(weight[:rank, :])

    # Lane-density fold: pack `fold` tokens per 128-lane row so both x loads
    # and output stores are lane-dense.
    fold = _choose_fold(k, rank, m)
    kf, nf, mf = fold * k, fold * rank, m // fold
    if fold > 1:
        # Block-diagonal replication of w_t: [kf, nf] (built once, resident).
        w_bd = jnp.kron(jnp.eye(fold, dtype=w_t.dtype), w_t)
    else:
        # Fallback (large or awkward K / m not divisible): still correct, the
        # full-dim blocks just use masked partial accesses.
        w_bd = w_t
    x2d = x.reshape(mf, kf)

    tm, vmem_limit = _pick_tile_m(mf, kf, nf, itemsize)
    grid_m = pl.cdiv(mf, tm)

    cost = pl.CostEstimate(
        flops=2 * mf * kf * nf,
        transcendentals=0,
        bytes_accessed=(mf * kf + kf * nf + mf * nf) * itemsize,
    )

    out2d = pl.pallas_call(
        _decay_linear_kernel,
        out_shape=jax.ShapeDtypeStruct((mf, nf), out_dtype),
        grid_spec=pltpu.PrefetchScalarGridSpec(
            num_scalar_prefetch=0,
            grid=(grid_m,),
            in_specs=[
                pl.BlockSpec((tm, kf), lambda i: (i, 0)),   # stream x tiles
                pl.BlockSpec((kf, nf), lambda i: (0, 0)),   # weight resident
            ],
            out_specs=pl.BlockSpec((tm, nf), lambda i: (i, 0)),
        ),
        compiler_params=pltpu.CompilerParams(
            dimension_semantics=("parallel",),   # megacore-shard M on v7x
            vmem_limit_bytes=vmem_limit,
        ),
        cost_estimate=cost,
    )(x2d, w_bd)

    # Unfold: row j of out2d holds `fold` consecutive tokens' outputs.
    return out2d.reshape(batch, seq, rank)


def decay_linear_first(x, weight, rank, *, weight_is_identity=False,
                       compute_dtype=None):
    """Forward of DecayLinearFirst: y = x @ weight[:rank, :].T.

    `weight_is_identity` should be threaded from the module's own bookkeeping
    (the weight is eye(in_features) until the first decayed training update);
    passing it avoids any per-call device->host sync.  `compute_dtype=bf16`
    opts into bf16 streaming (≈2x HBM-bandwidth win) when the model tolerates.
    """
    in_features = weight.shape[-1]
    rank = int(rank)
    if weight_is_identity:
        y = x if rank == in_features else x[..., :rank]
        return y.astype(compute_dtype) if compute_dtype is not None else y
    return _decay_linear_pallas(x, weight, rank=rank, compute_dtype=compute_dtype)


if __name__ == "__main__":
    in_features = 32
    decay_rate = 0.5
    batch, seq = 2, 8

    key = jax.random.PRNGKey(0)
    kx, kw = jax.random.split(key)
    x = jax.random.normal(kx, (batch, seq, in_features), dtype=jnp.float32)
    weight = jax.random.normal(kw, (in_features, in_features), dtype=jnp.float32)
    hi = jax.lax.Precision.HIGHEST

    # --- Case 1: decayed (non-identity) weight, full rank -> fold=8, kf=nf=256.
    rank = in_features
    y = decay_linear_first(x, weight, rank)
    jax.block_until_ready(y)
    y_ref = jnp.einsum("bsk,rk->bsr", x, weight[:rank, :], precision=hi)
    assert y.shape == (batch, seq, rank)
    err = jnp.max(jnp.abs(y - y_ref)) / (jnp.max(jnp.abs(y_ref)) + 1e-6)
    assert float(err) < 1e-5, f"mismatch (full rank), rel err={float(err)}"

    # --- Case 2: reduced rank after a decay step -> fold=8 gives lane-dense nf=128.
    rank2 = int(in_features * decay_rate)
    y2 = decay_linear_first(x, weight, rank2)
    jax.block_until_ready(y2)
    y2_ref = jnp.einsum("bsk,rk->bsr", x, weight[:rank2, :], precision=hi)
    assert y2.shape == (batch, seq, rank2)
    err2 = jnp.max(jnp.abs(y2 - y2_ref)) / (jnp.max(jnp.abs(y2_ref)) + 1e-6)
    assert float(err2) < 1e-5, f"mismatch (decayed rank), rel err={float(err2)}"

    # --- Case 3: initial identity weight (iter == 0), flag threaded from module
    # state -> short-circuit, y == x, no kernel launch and no host sync.
    w_eye = jnp.eye(in_features, dtype=jnp.float32)
    y3 = decay_linear_first(x, w_eye, in_features, weight_is_identity=True)
    jax.block_until_ready(y3)
    assert jnp.allclose(y3, x), "identity short-circuit mismatch"

    # --- Case 4: opt-in bf16 streaming path (smoke test, loose tolerance).
    y4 = decay_linear_first(x, weight, rank2, compute_dtype=jnp.bfloat16)
    jax.block_until_ready(y4)
    err4 = jnp.max(jnp.abs(y4.astype(jnp.float32) - y2_ref)) / (
        jnp.max(jnp.abs(y2_ref)) + 1e-6)
    assert float(err4) < 5e-2, f"mismatch (bf16 path), rel err={float(err4)}"

    print("KERNEL_OK")
</pallas_src>

<mosaic_0001>
module attributes {stable_mosaic.version = 11 : i64} {
  func.func @_decay_linear_kernel(%arg0: i32, %arg1: memref<2x256xf32, #tpu.memory_space<vmem>>, %arg2: memref<256x256xf32, #tpu.memory_space<vmem>>, %arg3: memref<2x256xf32, #tpu.memory_space<vmem>>) attributes {dimension_semantics = [#tpu.dimension_semantics<parallel>], iteration_bounds = array<i64: 1>, scalar_prefetch = 0 : i64, scratch_operands = 0 : i64, tpu.core_type = #tpu.core_type<tc>, window_params = [{transform_indices = @transform_0, window_bounds = array<i64: 2, 256>}, {pipeline_mode = #tpu.pipeline_mode<synchronous>, transform_indices = @transform_1, window_bounds = array<i64: 256, 256>}, {transform_indices = @transform_2, window_bounds = array<i64: 2, 256>}]} {
    %c0 = arith.constant 0 : index
    %c0_0 = arith.constant 0 : index
    %0 = vector.load %arg1[%c0, %c0_0] : memref<2x256xf32, #tpu.memory_space<vmem>>, vector<2x256xf32>
    %c0_1 = arith.constant 0 : index
    %c0_2 = arith.constant 0 : index
    %1 = vector.load %arg2[%c0_1, %c0_2] : memref<256x256xf32, #tpu.memory_space<vmem>>, vector<256x256xf32>
    %cst = arith.constant dense<0.000000e+00> : vector<2x256xf32>
    %2 = tpu.matmul %0, %1, %cst {dimension_numbers = #tpu.dot_dimension_numbers<[1], [0], [0], [1], [0, 0, 1, 1], [], []>} : vector<2x256xf32>, vector<256x256xf32>, vector<2x256xf32> -> vector<2x256xf32>
    %c0_3 = arith.constant 0 : index
    %c0_4 = arith.constant 0 : index
    %3 = vector.load %arg3[%c0_3, %c0_4] : memref<2x256xf32, #tpu.memory_space<vmem>>, vector<2x256xf32>
    tpu.vector_store %arg3[%c0_3, %c0_4], %2 {strides = array<i32>} : memref<2x256xf32, #tpu.memory_space<vmem>>, vector<2x256xf32>,
    return
  }
  func.func @transform_0(%arg0: i32) -> (i32, i32) {
    %c0_i32 = arith.constant 0 : i32
    %c0_i32_0 = arith.constant 0 : i32
    return %arg0, %c0_i32 : i32, i32
  }
  func.func @transform_1(%arg0: i32) -> (i32, i32) {
    %c0_i32 = arith.constant 0 : i32
    %c0_i32_0 = arith.constant 0 : i32
    %c0_i32_1 = arith.constant 0 : i32
    return %c0_i32, %c0_i32_0 : i32, i32
  }
  func.func @transform_2(%arg0: i32) -> (i32, i32) {
    %c0_i32 = arith.constant 0 : i32
    %c0_i32_0 = arith.constant 0 : i32
    return %arg0, %c0_i32 : i32, i32
  }
}

</mosaic_0001>

<bundles_post_ra>
// kernel: _decay_linear_pallas.1
= control target key start
LH: loop header
LB: loop body
LE: loop exit
PB: predicated region body
PF: predicated region fallthrough
CT: control target
= control target key end

     0   :  { %s458_s1 = inlined_call_operand.vmem [shape: f32[256,256], index: 1, kind: input, shape index: {}]   ;;  %s459_s0 = inlined_call_operand.vmem [shape: f32[2,256], index: 0, kind: input, shape index: {}]   ;;  %s460_s2 = inlined_call_operand.vmem [shape: f32[2,256], index: 2, kind: output, shape index: {}]  }
   0x1   :  { %v13_v0 = vld [vmem:[%s458_s1 + $0x8] sm:$0xff]  ;;  %v15_v1 = vld [vmem:[%s458_s1 + $0x18] sm:$0xff]  ;;  %v12_v2 = vld [vmem:[%s458_s1] sm:$0xff] }
   0x2   :  { %v176_v3 = vpack.c.bf16 %v15_v1, %v13_v0  ;;  %v14_v4 = vld [vmem:[%s458_s1 + $0x10] sm:$0xff]  ;;  %v17_v5 = vld [vmem:[%s458_s1 + $0x28] sm:$0xff]  ;;  %v19_v6 = vld [vmem:[%s458_s1 + $0x38] sm:$0xff] }
   0x3   :  { %v178_v7 = vpack.c.bf16 %v14_v4, %v12_v2  ;;  %v180_v8 = vpack.c.bf16 %v19_v6, %v17_v5  ;;  %v16_v9 = vld [vmem:[%s458_s1 + $0x20] sm:$0xff]  ;;  %v18_v10 = vld [vmem:[%s458_s1 + $0x30] sm:$0xff]  ;;  %v21_v11 = vld [vmem:[%s458_s1 + $0x48] sm:$0xff] }
   0x4   :  { %177 = vmatprep.subr.bf16.mxu0 %v176_v3  ;;  %v23_v12 = vld [vmem:[%s458_s1 + $0x58] sm:$0xff]  ;;  %v182_v13 = vpack.c.bf16 %v18_v10, %v16_v9  ;;  %v20_v15 = vld [vmem:[%s458_s1 + $0x40] sm:$0xff]  ;;  %v22_v16 = vld [vmem:[%s458_s1 + $0x50] sm:$0xff] }
   0x5   :  { %179 = vmatpush1.bf16.msra.mxu0 %v178_v7  ;;  %v184_v14 = vpack.c.bf16 %v23_v12, %v21_v11  ;;  %v25_v17 = vld [vmem:[%s458_s1 + $0x68] sm:$0xff]  ;;  %v27_v18 = vld [vmem:[%s458_s1 + $0x78] sm:$0xff]  ;;  %v186_v19 = vpack.c.bf16 %v22_v16, %v20_v15  ;;  %v24_v21 = vld [vmem:[%s458_s1 + $0x60] sm:$0xff] }
   0x6   :  { %181 = vmatprep.subr.bf16.mxu0 %v180_v8  ;;  %v188_v20 = vpack.c.bf16 %v27_v18, %v25_v17  ;;  %v26_v22 = vld [vmem:[%s458_s1 + $0x70] sm:$0xff]  ;;  %v29_v23 = vld [vmem:[%s458_s1 + $0x88] sm:$0xff]  ;;  %v31_v24 = vld [vmem:[%s458_s1 + $0x98] sm:$0xff] }
   0x7   :  { %v190_v25 = vpack.c.bf16 %v26_v22, %v24_v21  ;;  %v192_v26 = vpack.c.bf16 %v31_v24, %v29_v23  ;;  %v28_v27 = vld [vmem:[%s458_s1 + $0x80] sm:$0xff]  ;;  %v30_v28 = vld [vmem:[%s458_s1 + $0x90] sm:$0xff]  ;;  %v33_v29 = vld [vmem:[%s458_s1 + $0xa8] sm:$0xff] }
   0x8   :  { %v35_v30 = vld [vmem:[%s458_s1 + $0xb8] sm:$0xff]  ;;  %v194_v31 = vpack.c.bf16 %v30_v28, %v28_v27  ;;  %v32_v33 = vld [vmem:[%s458_s1 + $0xa0] sm:$0xff]  ;;  %v34_v34 = vld [vmem:[%s458_s1 + $0xb0] sm:$0xff] }
   0x9   :  { %183 = vmatpush1.bf16.msra.mxu0 %v182_v13  ;;  %v196_v32 = vpack.c.bf16 %v35_v30, %v33_v29  ;;  %v37_v35 = vld [vmem:[%s458_s1 + $0xc8] sm:$0xff]  ;;  %v39_v36 = vld [vmem:[%s458_s1 + $0xd8] sm:$0xff]  ;;  %v198_v37 = vpack.c.bf16 %v34_v34, %v32_v33  ;;  %v36_v39 = vld [vmem:[%s458_s1 + $0xc0] sm:$0xff] }
   0xa   :  { %185 = vmatprep.subr.bf16.mxu0 %v184_v14  ;;  %v200_v38 = vpack.c.bf16 %v39_v36, %v37_v35  ;;  %v38_v40 = vld [vmem:[%s458_s1 + $0xd0] sm:$0xff]  ;;  %v342_v41 = vld.sshfl [vmem:[%s459_s0] sm:$0x33 pattern:$0x76325410]  ;;  %v41_v42 = vld [vmem:[%s458_s1 + $0xe8] sm:$0xff] }
   0xb   :  { %v43_v43 = vld [vmem:[%s458_s1 + $0xf8] sm:$0xff]  ;;  %v84_v44 = vcombine.high %v342_v41, %v342_v41  ;;  %v202_v45 = vpack.c.bf16 %v38_v40, %v36_v39  ;;  %v40_v47 = vld [vmem:[%s458_s1 + $0xe0] sm:$0xff]  ;;  %v42_v48 = vld [vmem:[%s458_s1 + $0xf0] sm:$0xff] }
   0xc   :  { %v204_v46 = vpack.c.bf16 %v43_v43, %v41_v42  ;;  %v45_v49 = vld [vmem:[%s458_s1 + $0x108] sm:$0xff]  ;;  %v47_v50 = vld [vmem:[%s458_s1 + $0x118] sm:$0xff]  ;;  %v206_v51 = vpack.c.bf16 %v42_v48, %v40_v47  ;;  %v44_v53 = vld [vmem:[%s458_s1 + $0x100] sm:$0xff] }
   0xd   :  { %187 = vmatpush1.bf16.msra.mxu0 %v186_v19  ;;  %151 = vmatprep.mubr.f32.mxu0 %v84_v44  ;;  %v208_v52 = vpack.c.bf16 %v47_v50, %v45_v49  ;;  %v46_v54 = vld [vmem:[%s458_s1 + $0x110] sm:$0xff]  ;;  %v49_v55 = vld [vmem:[%s458_s1 + $0x128] sm:$0xff]  ;;  %v51_v56 = vld [vmem:[%s458_s1 + $0x138] sm:$0xff] }
   0xe   :  { %189 = vmatprep.subr.bf16.mxu0 %v188_v20  ;;  %v210_v57 = vpack.c.bf16 %v46_v54, %v44_v53  ;;  %v212_v58 = vpack.c.bf16 %v51_v56, %v49_v55  ;;  %v48_v59 = vld [vmem:[%s458_s1 + $0x120] sm:$0xff]  ;;  %v50_v60 = vld [vmem:[%s458_s1 + $0x130] sm:$0xff]  ;;  %v53_v61 = vld [vmem:[%s458_s1 + $0x148] sm:$0xff] }
   0xf   :  { %v55_v62 = vld [vmem:[%s458_s1 + $0x158] sm:$0xff]  ;;  %v214_v63 = vpack.c.bf16 %v50_v60, %v48_v59  ;;  %v52_v1 = vld [vmem:[%s458_s1 + $0x140] sm:$0xff]  ;;  %v54_v2 = vld [vmem:[%s458_s1 + $0x150] sm:$0xff] }
  0x10   :  { %v216_v0 = vpack.c.bf16 %v55_v62, %v53_v61  ;;  %v57_v3 = vld [vmem:[%s458_s1 + $0x168] sm:$0xff]  ;;  %v59_v4 = vld [vmem:[%s458_s1 + $0x178] sm:$0xff]  ;;  %v218_v5 = vpack.c.bf16 %v54_v2, %v52_v1  ;;  %v56_v7 = vld [vmem:[%s458_s1 + $0x160] sm:$0xff] }
  0x11   :  { %191 = vmatpush1.bf16.msra.mxu0 %v190_v25  ;;  %v220_v6 = vpack.c.bf16 %v59_v4, %v57_v3  ;;  %v58_v8 = vld [vmem:[%s458_s1 + $0x170] sm:$0xff]  ;;  %v61_v9 = vld [vmem:[%s458_s1 + $0x188] sm:$0xff]  ;;  %v63_v10 = vld [vmem:[%s458_s1 + $0x198] sm:$0xff] }
  0x12   :  { %193 = vmatprep.subr.bf16.mxu0 %v192_v26  ;;  %v222_v11 = vpack.c.bf16 %v58_v8, %v56_v7  ;;  %v224_v12 = vpack.c.bf16 %v63_v10, %v61_v9  ;;  %v60_v13 = vld [vmem:[%s458_s1 + $0x180] sm:$0xff]  ;;  %v62_v14 = vld [vmem:[%s458_s1 + $0x190] sm:$0xff]  ;;  %v65_v15 = vld [vmem:[%s458_s1 + $0x1a8] sm:$0xff] }
  0x13   :  { %v67_v16 = vld [vmem:[%s458_s1 + $0x1b8] sm:$0xff]  ;;  %v226_v17 = vpack.c.bf16 %v62_v14, %v60_v13  ;;  %v64_v19 = vld [vmem:[%s458_s1 + $0x1a0] sm:$0xff]  ;;  %v66_v20 = vld [vmem:[%s458_s1 + $0x1b0] sm:$0xff] }
  0x14   :  { %v228_v18 = vpack.c.bf16 %v67_v16, %v65_v15  ;;  %v69_v21 = vld [vmem:[%s458_s1 + $0x1c8] sm:$0xff]  ;;  %v71_v22 = vld [vmem:[%s458_s1 + $0x1d8] sm:$0xff]  ;;  %v230_v23 = vpack.c.bf16 %v66_v20, %v64_v19  ;;  %v68_v25 = vld [vmem:[%s458_s1 + $0x1c0] sm:$0xff] }
  0x15   :  { %195 = vmatpush1.bf16.msra.mxu0 %v194_v31  ;;  %v232_v24 = vpack.c.bf16 %v71_v22, %v69_v21  ;;  %v70_v26 = vld [vmem:[%s458_s1 + $0x1d0] sm:$0xff]  ;;  %v73_v27 = vld [vmem:[%s458_s1 + $0x1e8] sm:$0xff]  ;;  %v75_v28 = vld [vmem:[%s458_s1 + $0x1f8] sm:$0xff] }
  0x16   :  { %197 = vmatprep.subr.bf16.mxu0 %v196_v32  ;;  %v234_v29 = vpack.c.bf16 %v70_v26, %v68_v25  ;;  %v236_v30 = vpack.c.bf16 %v75_v28, %v73_v27  ;;  %v72_v31 = vld [vmem:[%s458_s1 + $0x1e0] sm:$0xff]  ;;  %v74_v32 = vld [vmem:[%s458_s1 + $0x1f0] sm:$0xff] }
  0x17   :  { %v238_v33 = vpack.c.bf16 %v74_v32, %v72_v31 }
  0x19   :  { %199 = vmatpush1.bf16.msra.mxu0 %v198_v37 }
  0x1a   :  { %201 = vmatprep.subr.bf16.mxu0 %v200_v38 }
  0x1d   :  { %203 = vmatpush1.bf16.msra.mxu0 %v202_v45 }
  0x1e   :  { %205 = vmatprep.subr.bf16.mxu0 %v204_v46 }
  0x21   :  { %207 = vmatpush1.bf16.msra.mxu0 %v206_v51 }
  0x22   :  { %209 = vmatprep.subr.bf16.mxu0 %v208_v52 }
  0x25   :  { %211 = vmatpush1.bf16.msra.mxu0 %v210_v57 }
  0x26   :  { %213 = vmatprep.subr.bf16.mxu0 %v212_v58 }
  0x29   :  { %215 = vmatpush1.bf16.msra.mxu0 %v214_v63 }
  0x2a   :  { %217 = vmatprep.subr.bf16.mxu0 %v216_v0 }
  0x2d   :  { %219 = vmatpush1.bf16.msra.mxu0 %v218_v5 }
  0x2e   :  { %221 = vmatprep.subr.bf16.mxu0 %v220_v6 }
  0x31   :  { %223 = vmatpush1.bf16.msra.mxu0 %v222_v11 }
  0x32   :  { %225 = vmatprep.subr.bf16.mxu0 %v224_v12 }
  0x35   :  { %227 = vmatpush1.bf16.msra.mxu0 %v226_v17 }
  0x36   :  { %229 = vmatprep.subr.bf16.mxu0 %v228_v18 }
  0x39   :  { %231 = vmatpush1.bf16.msra.mxu0 %v230_v23 }
  0x3a   :  { %233 = vmatprep.subr.bf16.mxu0 %v232_v24 }
  0x3d   :  { %235 = vmatpush1.bf16.msra.mxu0 %v234_v29 }
  0x3e   :  { %237 = vmatprep.subr.bf16.mxu0 %v236_v30 }
  0x41   :  { %239 = vmatpush1.bf16.msra.mxu0 %v238_v33 }
  0x44   :  { %152 = vmatmul.mubr.f32.vlgmr.msra.gmra.mrb[0].mxu0 %v342_v41 }
 0x117   :  { %v153_v34 = vpop.f32.mrb[0].mxu0 }
 0x118   :  { %v155_v35 = vpop.f32.mrb[1].mxu0 }
 0x119   :  { %v160_v36 = vcombine.low %v153_v34, %v155_v35 }
 0x11b   :  { %175 = vst.sshfl [vmem:[%s460_s2] sm:$0x33 pattern:$0x76325410] %v160_v36 }

</bundles_post_ra>
